<compile_context>
chip_gen: v6e
topology: v6e:2x2x1
jax: 0.10.0
libtpu: 0.0.40
codegen_flags: <defaults>
</compile_context>

<pallas_src>
import math

import jax
import jax.numpy as jnp
from jax import lax
from jax.experimental import pallas as pl
from jax.experimental.pallas import tpu as pltpu

_INV_SQRT2 = 1.0 / math.sqrt(2.0)
_LN_EPS = 1e-5


# ----------------------------------------------------------------------------
# kernel bodies
# ----------------------------------------------------------------------------
def _gelu_exact(h):
    # exact (erf) GELU, matching torch.nn.GELU() defaults; f32 throughout.
    return 0.5 * h * (1.0 + lax.erf(h * _INV_SQRT2))


def _layernorm_affine(z, gamma_f32, beta_f32, out_dtype):
    mean = jnp.mean(z, axis=-1, keepdims=True)
    zc = z - mean
    var = jnp.mean(zc * zc, axis=-1, keepdims=True)
    zn = zc * lax.rsqrt(var + _LN_EPS)
    return (zn * gamma_f32 + beta_f32).astype(out_dtype)


def _mlp_resident_kernel(x_ref, w1_ref, b1_ref, w2_ref, b2_ref,
                         gamma_ref, beta_ref, o_ref):
    """One grid step per token tile; w1/w2 fully VMEM-resident."""
    x = x_ref[...]                                         # (tn, E)
    h = jnp.dot(x.astype(w1_ref.dtype), w1_ref[...],
                preferred_element_type=jnp.float32)
    h = _gelu_exact(h + b1_ref[...].astype(jnp.float32))
    y = jnp.dot(h.astype(w2_ref.dtype), w2_ref[...],
                preferred_element_type=jnp.float32)
    # TODO(synk): dropout is identity here (eval mode); train mode would mask
    # y using pltpu.prng_seed / pltpu.prng_random_bits.
    z = y + b2_ref[...].astype(jnp.float32) + x.astype(jnp.float32)
    o_ref[...] = _layernorm_affine(z,
                                   gamma_ref[...].astype(jnp.float32),
                                   beta_ref[...].astype(jnp.float32),
                                   o_ref.dtype)


def _mlp_chunked_kernel(x_ref, w1_ref, b1_ref, w2_ref, b2_ref,
                        gamma_ref, beta_ref, o_ref, acc_ref, xw_ref):
    """grid = (token_tiles, m_chunks); axis 1 walks the MLP hidden dim."""
    k = pl.program_id(1)
    nk = pl.num_programs(1)

    @pl.when(k == 0)
    def _():
        # hoist the x -> MXU-operand-dtype cast out of the k loop.
        xw_ref[...] = x_ref[...].astype(xw_ref.dtype)

    h = jnp.dot(xw_ref[...], w1_ref[...], preferred_element_type=jnp.float32)
    h = _gelu_exact(h + b1_ref[...].astype(jnp.float32))
    part = jnp.dot(h.astype(w2_ref.dtype), w2_ref[...],
                   preferred_element_type=jnp.float32)

    @pl.when(k == 0)
    def _():
        # seed the accumulator with (first partial + bias + residual):
        # no zero-init / += round trip for the first chunk.
        acc_ref[...] = (part + b2_ref[...].astype(jnp.float32)
                        + x_ref[...].astype(jnp.float32))

    @pl.when(k > 0)
    def _():
        acc_ref[...] += part

    @pl.when(k == nk - 1)
    def _():
        # TODO(synk): dropout identity (eval mode).
        # Zero-padded token rows see b2-only activations here; eps keeps the
        # rsqrt finite and the wrapper slices those rows off.
        o_ref[...] = _layernorm_affine(acc_ref[...],
                                       gamma_ref[...].astype(jnp.float32),
                                       beta_ref[...].astype(jnp.float32),
                                       o_ref.dtype)


# ----------------------------------------------------------------------------
# planning helpers
# ----------------------------------------------------------------------------
def _round_up(a, b):
    return (a + b - 1) // b * b


def _vmem_budget_bytes():
    """~80% of this chip's per-core VMEM (headroom for Mosaic scratch)."""
    cap = 64 << 20  # conservative default: v7x has 64 MiB per TensorCore
    try:
        cap = int(getattr(pltpu.get_tpu_info(), "vmem_capacity_bytes", cap))
    except Exception:
        pass
    return max(int(cap * 0.8), 16 << 20)


def _token_tile_candidates(N, desired):
    full = _round_up(max(N, 1), 8)
    cap = full
    if full > 256:
        # keep >= 2 balanced token tiles so both v7x TensorCores get work
        # (and HBM bandwidth stays balanced across them).
        cap = min(full, _round_up((full + 1) // 2, 128))
    head = max(8, min(_round_up(int(desired), 8), cap))
    return [head] + [c for c in (1024, 512, 256, 128, 64, 32, 16, 8)
                     if c < head]


def _plan(N, E, M, x_bytes, w_bytes, budget, desired_res, desired_chu,
          mode, mlp_chunk):
    """Pick (path, token tile, M chunk, weight buffer count, vmem estimate)."""
    weight_bytes = (E * M + M * E) * w_bytes
    # single-buffer the resident weights when two copies would eat the budget
    wbuf = 1 if (2 * weight_bytes > budget // 2) else 2

    def resident_est(tn):
        return (wbuf * weight_bytes                    # resident w1 + w2
                + 4 * tn * E * x_bytes                 # double-buffered x / out
                + tn * M * 4                           # f32 hidden intermediate
                + 4 * tn * E * 4                       # f32 epilogue temporaries
                + 2 * (M + 3 * E) * 4)                 # bias / gamma / beta

    def chunked_est(tn, tM):
        return (4 * E * tM * w_bytes                   # double-buffered w1/w2 slabs
                + 4 * tn * E * x_bytes                 # double-buffered x / out
                + tn * E * 4                           # f32 accumulator scratch
                + tn * E * w_bytes                     # hoisted-cast scratch
                + tn * tM * 4                          # f32 hidden intermediate
                + 4 * tn * E * 4                       # f32 epilogue temporaries
                + 2 * (tM + 3 * E) * 4)

    def chunk_sizes():
        if (mlp_chunk is not None and M % int(mlp_chunk) == 0
                and (int(mlp_chunk) % 128 == 0 or int(mlp_chunk) == M)):
            return [int(mlp_chunk)]
        sizes = [c for c in (4096, 2048, 1024, 512, 256, 128) if M % c == 0]
        return sizes or [M]

    # Resident path first: weight HBM traffic paid exactly once.
    if mode in ("auto", "resident"):
        for tn in _token_tile_candidates(N, desired_res):
            if resident_est(tn) <= budget:
                return dict(path="resident", tn=tn, tM=M, wbuf=wbuf,
                            vmem_est=resident_est(tn))
        if mode == "resident":
            tn = _token_tile_candidates(N, desired_res)[-1]
            return dict(path="resident", tn=tn, tM=M, wbuf=wbuf,
                        vmem_est=resident_est(tn))

    # Chunked fallback: weights re-streamed per token tile, so push the token
    # tile as large as the budget allows (arithmetic intensity ~ tn).
    for tn in _token_tile_candidates(N, desired_chu):
        for tM in chunk_sizes():
            if chunked_est(tn, tM) <= budget:
                return dict(path="chunked", tn=tn, tM=tM, wbuf=2,
                            vmem_est=chunked_est(tn, tM))
    tn = _token_tile_candidates(N, desired_chu)[-1]
    tM = chunk_sizes()[-1]
    return dict(path="chunked", tn=tn, tM=tM, wbuf=2,
                vmem_est=chunked_est(tn, tM))


# ----------------------------------------------------------------------------
# wrapper
# ----------------------------------------------------------------------------
def mlp_block(x, w1, b1, w2, b2, gamma, beta, *,
              token_tile=None, mlp_chunk=None, mode="auto"):
    """Fused ViT MLPBlock forward.

    x: [B, S, E].  w1: [E, M], b1: [M], w2: [M, E], b2: [E], gamma/beta: [E].
    Weights are [in, out] (PyTorch nn.Linear weight transposed).
    mode: "auto" | "resident" | "chunked".
    """
    assert mode in ("auto", "resident", "chunked")
    B, S, E = x.shape
    M = w1.shape[1]
    N = B * S

    x_bytes = jnp.dtype(x.dtype).itemsize
    w_bytes = jnp.dtype(w1.dtype).itemsize
    budget = _vmem_budget_bytes()
    desired_res = token_tile if token_tile is not None else 512
    desired_chu = token_tile if token_tile is not None else 1024

    plan = _plan(N, E, M, x_bytes, w_bytes, budget,
                 desired_res, desired_chu, mode, mlp_chunk)
    tn = plan["tn"]
    Np = _round_up(N, tn)
    num_tiles = Np // tn

    x2 = x.reshape(N, E)
    if Np != N:
        # zero-padded rows flow through harmlessly and are sliced off below.
        x2 = jnp.pad(x2, ((0, Np - N), (0, 0)))
    b1_2 = b1.reshape(1, M)
    b2_2 = b2.reshape(1, E)
    g2 = gamma.reshape(1, E)
    be2 = beta.reshape(1, E)

    vmem_limit = None
    if plan["vmem_est"] > (32 << 20):
        vmem_limit = int(min(max(plan["vmem_est"] * 5 // 4, 32 << 20), budget))

    if plan["path"] == "resident":
        def _wspec(shape):
            if plan["wbuf"] == 1:
                # constant blocks never need a second in-flight buffer.
                return pl.BlockSpec(shape, lambda i: (0, 0),
                                    pipeline_mode=pl.Buffered(1))
            return pl.BlockSpec(shape, lambda i: (0, 0))

        cost = pl.CostEstimate(
            flops=int(4 * N * E * M + 10 * N * E),
            transcendentals=int(N * M),
            bytes_accessed=int(2 * Np * E * x_bytes
                               + (2 * E * M + M + 3 * E) * w_bytes),
        )
        out = pl.pallas_call(
            _mlp_resident_kernel,
            out_shape=jax.ShapeDtypeStruct((Np, E), x.dtype),
            grid_spec=pltpu.PrefetchScalarGridSpec(
                num_scalar_prefetch=0,
                grid=(num_tiles,),
                in_specs=[
                    pl.BlockSpec((tn, E), lambda i: (i, 0)),   # x tile
                    _wspec((E, M)),                            # w1 (resident)
                    pl.BlockSpec((1, M), lambda i: (0, 0)),    # b1
                    _wspec((M, E)),                            # w2 (resident)
                    pl.BlockSpec((1, E), lambda i: (0, 0)),    # b2
                    pl.BlockSpec((1, E), lambda i: (0, 0)),    # gamma
                    pl.BlockSpec((1, E), lambda i: (0, 0)),    # beta
                ],
                out_specs=pl.BlockSpec((tn, E), lambda i: (i, 0)),
            ),
            compiler_params=pltpu.CompilerParams(
                dimension_semantics=("parallel",),
                vmem_limit_bytes=vmem_limit),
            cost_estimate=cost,
        )(x2, w1, b1_2, w2, b2_2, g2, be2)
    else:
        tM = plan["tM"]
        nk = M // tM
        cost = pl.CostEstimate(
            flops=int(4 * N * E * M + 10 * N * E),
            transcendentals=int(N * M),
            # weights are re-streamed once per token tile in this scheme.
            bytes_accessed=int(2 * Np * E * x_bytes
                               + num_tiles * (2 * E * M + M) * w_bytes
                               + 3 * E * w_bytes),
        )
        out = pl.pallas_call(
            _mlp_chunked_kernel,
            out_shape=jax.ShapeDtypeStruct((Np, E), x.dtype),
            grid_spec=pltpu.PrefetchScalarGridSpec(
                num_scalar_prefetch=0,
                grid=(num_tiles, nk),
                in_specs=[
                    pl.BlockSpec((tn, E), lambda i, k: (i, 0)),   # x (resident over k)
                    pl.BlockSpec((E, tM), lambda i, k: (0, k)),   # w1 chunk
                    pl.BlockSpec((1, tM), lambda i, k: (0, k)),   # b1 chunk
                    pl.BlockSpec((tM, E), lambda i, k: (k, 0)),   # w2 chunk
                    pl.BlockSpec((1, E), lambda i, k: (0, 0)),    # b2
                    pl.BlockSpec((1, E), lambda i, k: (0, 0)),    # gamma
                    pl.BlockSpec((1, E), lambda i, k: (0, 0)),    # beta
                ],
                out_specs=pl.BlockSpec((tn, E), lambda i, k: (i, 0)),
                scratch_shapes=[
                    pltpu.VMEM((tn, E), jnp.float32),   # fc2 accumulator
                    pltpu.VMEM((tn, E), w1.dtype),      # hoisted x cast
                ],
            ),
            compiler_params=pltpu.CompilerParams(
                dimension_semantics=("parallel", "arbitrary"),
                vmem_limit_bytes=vmem_limit),
            cost_estimate=cost,
        )(x2, w1, b1_2, w2, b2_2, g2, be2)

    return out[:N].reshape(B, S, E)


# ----------------------------------------------------------------------------
# pure-JAX reference (mirrors the kernel's MXU operand dtype = weight dtype)
# ----------------------------------------------------------------------------
def _reference(x, w1, b1, w2, b2, gamma, beta):
    wdt = w1.dtype
    xf = x.astype(jnp.float32)
    h = jnp.dot(x.astype(wdt), w1, preferred_element_type=jnp.float32)
    h = h + b1.astype(jnp.float32)
    h = 0.5 * h * (1.0 + lax.erf(h * _INV_SQRT2))
    y = jnp.dot(h.astype(wdt), w2, preferred_element_type=jnp.float32)
    z = y + b2.astype(jnp.float32) + xf
    mean = jnp.mean(z, axis=-1, keepdims=True)
    var = jnp.mean((z - mean) ** 2, axis=-1, keepdims=True)
    zn = (z - mean) * lax.rsqrt(var + _LN_EPS)
    return (zn * gamma.astype(jnp.float32)
            + beta.astype(jnp.float32)).astype(x.dtype)


if __name__ == "__main__":
    key = jax.random.PRNGKey(0)
    kx, k1, k2, k3, k4, k5 = jax.random.split(key, 6)

    # ---- case 1: small ViT-ish shapes; auto picks the resident-weight path --
    B, S, E, M = 2, 8, 32, 64
    x = jax.random.normal(kx, (B, S, E), dtype=jnp.float32)
    w1 = jax.random.uniform(k1, (E, M), jnp.float32,
                            -1.0 / math.sqrt(E), 1.0 / math.sqrt(E))
    b1 = jax.random.uniform(k2, (M,), jnp.float32,
                            -1.0 / math.sqrt(E), 1.0 / math.sqrt(E))
    w2 = jax.random.uniform(k3, (M, E), jnp.float32,
                            -1.0 / math.sqrt(M), 1.0 / math.sqrt(M))
    b2 = jax.random.uniform(k4, (E,), jnp.float32,
                            -1.0 / math.sqrt(M), 1.0 / math.sqrt(M))
    gamma = jnp.ones((E,), jnp.float32)   # LayerNorm default init
    beta = jnp.zeros((E,), jnp.float32)

    out = jax.block_until_ready(mlp_block(x, w1, b1, w2, b2, gamma, beta))
    ref = _reference(x, w1, b1, w2, b2, gamma, beta)
    assert out.shape == (B, S, E)
    assert jnp.allclose(out, ref, atol=1e-4, rtol=1e-4), "resident path mismatch"

    # ---- case 2: ragged token count exercises the zero-padding path ---------
    xr = x[:, :5, :]
    out_r = jax.block_until_ready(mlp_block(xr, w1, b1, w2, b2, gamma, beta))
    ref_r = _reference(xr, w1, b1, w2, b2, gamma, beta)
    assert out_r.shape == xr.shape
    assert jnp.allclose(out_r, ref_r, atol=1e-4, rtol=1e-4), "ragged mismatch"

    # ---- case 3: forced chunked-k fallback (hidden dim split over the grid) -
    E2, M2 = 32, 256
    xk = jax.random.normal(k5, (B, S, E2), dtype=jnp.float32)
    w1k = jax.random.uniform(k1, (E2, M2), jnp.float32,
                             -1.0 / math.sqrt(E2), 1.0 / math.sqrt(E2))
    b1k = jax.random.uniform(k2, (M2,), jnp.float32,
                             -1.0 / math.sqrt(E2), 1.0 / math.sqrt(E2))
    w2k = jax.random.uniform(k3, (M2, E2), jnp.float32,
                             -1.0 / math.sqrt(M2), 1.0 / math.sqrt(M2))
    b2k = jax.random.uniform(k4, (E2,), jnp.float32,
                             -1.0 / math.sqrt(M2), 1.0 / math.sqrt(M2))
    gk = jnp.ones((E2,), jnp.float32)
    bk = jnp.zeros((E2,), jnp.float32)
    out_c = jax.block_until_ready(
        mlp_block(xk, w1k, b1k, w2k, b2k, gk, bk, mode="chunked", mlp_chunk=128))
    ref_c = _reference(xk, w1k, b1k, w2k, b2k, gk, bk)
    assert jnp.allclose(out_c, ref_c, atol=1e-4, rtol=1e-4), "chunked path mismatch"

    # ---- case 4: bf16 weights (production MXU dtype), looser tolerance ------
    out_b = jax.block_until_ready(
        mlp_block(x, w1.astype(jnp.bfloat16), b1, w2.astype(jnp.bfloat16),
                  b2, gamma, beta))
    ref_b = _reference(x, w1.astype(jnp.bfloat16), b1, w2.astype(jnp.bfloat16),
                       b2, gamma, beta)
    assert jnp.allclose(out_b.astype(jnp.float32), ref_b.astype(jnp.float32),
                        atol=3e-2, rtol=3e-2), "bf16 weight mismatch"

    print("KERNEL_OK")
</pallas_src>

<mosaic_0001>
module attributes {stable_mosaic.version = 11 : i64} {
  func.func @_mlp_resident_kernel(%arg0: i32, %arg1: memref<16x32xf32, #tpu.memory_space<vmem>>, %arg2: memref<32x64xf32, #tpu.memory_space<vmem>>, %arg3: memref<1x64xf32, #tpu.memory_space<vmem>>, %arg4: memref<64x32xf32, #tpu.memory_space<vmem>>, %arg5: memref<1x32xf32, #tpu.memory_space<vmem>>, %arg6: memref<1x32xf32, #tpu.memory_space<vmem>>, %arg7: memref<1x32xf32, #tpu.memory_space<vmem>>, %arg8: memref<16x32xf32, #tpu.memory_space<vmem>>) attributes {dimension_semantics = [#tpu.dimension_semantics<parallel>], iteration_bounds = array<i64: 1>, scalar_prefetch = 0 : i64, scratch_operands = 0 : i64, tpu.core_type = #tpu.core_type<tc>, window_params = [{transform_indices = @transform_0, window_bounds = array<i64: 16, 32>}, {pipeline_mode = #tpu.pipeline_mode<synchronous>, transform_indices = @transform_1, window_bounds = array<i64: 32, 64>}, {pipeline_mode = #tpu.pipeline_mode<synchronous>, transform_indices = @transform_2, window_bounds = array<i64: 1, 64>}, {pipeline_mode = #tpu.pipeline_mode<synchronous>, transform_indices = @transform_3, window_bounds = array<i64: 64, 32>}, {pipeline_mode = #tpu.pipeline_mode<synchronous>, transform_indices = @transform_4, window_bounds = array<i64: 1, 32>}, {pipeline_mode = #tpu.pipeline_mode<synchronous>, transform_indices = @transform_5, window_bounds = array<i64: 1, 32>}, {pipeline_mode = #tpu.pipeline_mode<synchronous>, transform_indices = @transform_6, window_bounds = array<i64: 1, 32>}, {transform_indices = @transform_7, window_bounds = array<i64: 16, 32>}]} {
    %c0 = arith.constant 0 : index
    %c0_0 = arith.constant 0 : index
    %0 = vector.load %arg1[%c0, %c0_0] : memref<16x32xf32, #tpu.memory_space<vmem>>, vector<16x32xf32>
    %c0_1 = arith.constant 0 : index
    %c0_2 = arith.constant 0 : index
    %1 = vector.load %arg2[%c0_1, %c0_2] : memref<32x64xf32, #tpu.memory_space<vmem>>, vector<32x64xf32>
    %cst = arith.constant dense<0.000000e+00> : vector<16x64xf32>
    %2 = tpu.matmul %0, %1, %cst {dimension_numbers = #tpu.dot_dimension_numbers<[1], [0], [0], [1], [0, 0, 1, 1], [], []>} : vector<16x32xf32>, vector<32x64xf32>, vector<16x64xf32> -> vector<16x64xf32>
    %c0_3 = arith.constant 0 : index
    %c0_4 = arith.constant 0 : index
    %3 = vector.load %arg3[%c0_3, %c0_4] : memref<1x64xf32, #tpu.memory_space<vmem>>, vector<1x64xf32>
    %4 = vector.broadcast %3 : vector<1x64xf32> to vector<16x64xf32>
    %5 = arith.addf %2, %4 : vector<16x64xf32>
    %cst_5 = arith.constant 5.000000e-01 : f32
    %6 = vector.broadcast %cst_5 : f32 to vector<16x64xf32>
    %7 = arith.mulf %6, %5 : vector<16x64xf32>
    %cst_6 = arith.constant 0.707106769 : f32
    %8 = vector.broadcast %cst_6 : f32 to vector<16x64xf32>
    %9 = arith.mulf %5, %8 : vector<16x64xf32>
    %10 = math.erf %9 : vector<16x64xf32>
    %cst_7 = arith.constant 1.000000e+00 : f32
    %11 = vector.broadcast %cst_7 : f32 to vector<16x64xf32>
    %12 = arith.addf %11, %10 : vector<16x64xf32>
    %13 = arith.mulf %7, %12 : vector<16x64xf32>
    %c0_8 = arith.constant 0 : index
    %c0_9 = arith.constant 0 : index
    %14 = vector.load %arg4[%c0_8, %c0_9] : memref<64x32xf32, #tpu.memory_space<vmem>>, vector<64x32xf32>
    %cst_10 = arith.constant dense<0.000000e+00> : vector<16x32xf32>
    %15 = tpu.matmul %13, %14, %cst_10 {dimension_numbers = #tpu.dot_dimension_numbers<[1], [0], [0], [1], [0, 0, 1, 1], [], []>} : vector<16x64xf32>, vector<64x32xf32>, vector<16x32xf32> -> vector<16x32xf32>
    %c0_11 = arith.constant 0 : index
    %c0_12 = arith.constant 0 : index
    %16 = vector.load %arg5[%c0_11, %c0_12] : memref<1x32xf32, #tpu.memory_space<vmem>>, vector<1x32xf32>
    %17 = vector.broadcast %16 : vector<1x32xf32> to vector<16x32xf32>
    %18 = arith.addf %15, %17 : vector<16x32xf32>
    %19 = arith.addf %18, %0 : vector<16x32xf32>
    %c0_13 = arith.constant 0 : index
    %c0_14 = arith.constant 0 : index
    %20 = vector.load %arg6[%c0_13, %c0_14] : memref<1x32xf32, #tpu.memory_space<vmem>>, vector<1x32xf32>
    %c0_15 = arith.constant 0 : index
    %c0_16 = arith.constant 0 : index
    %21 = vector.load %arg7[%c0_15, %c0_16] : memref<1x32xf32, #tpu.memory_space<vmem>>, vector<1x32xf32>
    %cst_17 = arith.constant dense<0.000000e+00> : vector<16xf32>
    %22 = vector.multi_reduction <add>, %19, %cst_17 [1] : vector<16x32xf32> to vector<16xf32>
    %23 = vector.shape_cast %22 : vector<16xf32> to vector<16x1xf32>
    %cst_18 = arith.constant 3.200000e+01 : f32
    %24 = vector.broadcast %cst_18 : f32 to vector<16x1xf32>
    %25 = arith.divf %23, %24 : vector<16x1xf32>
    %26 = vector.broadcast %25 : vector<16x1xf32> to vector<16x32xf32>
    %27 = arith.subf %19, %26 : vector<16x32xf32>
    %28 = arith.mulf %27, %27 : vector<16x32xf32>
    %cst_19 = arith.constant dense<0.000000e+00> : vector<16xf32>
    %29 = vector.multi_reduction <add>, %28, %cst_19 [1] : vector<16x32xf32> to vector<16xf32>
    %30 = vector.shape_cast %29 : vector<16xf32> to vector<16x1xf32>
    %cst_20 = arith.constant 3.200000e+01 : f32
    %31 = vector.broadcast %cst_20 : f32 to vector<16x1xf32>
    %32 = arith.divf %30, %31 : vector<16x1xf32>
    %cst_21 = arith.constant 9.99999974E-6 : f32
    %33 = vector.broadcast %cst_21 : f32 to vector<16x1xf32>
    %34 = arith.addf %32, %33 : vector<16x1xf32>
    %35 = math.rsqrt %34 : vector<16x1xf32>
    %36 = vector.broadcast %35 : vector<16x1xf32> to vector<16x32xf32>
    %37 = arith.mulf %27, %36 : vector<16x32xf32>
    %38 = vector.broadcast %20 : vector<1x32xf32> to vector<16x32xf32>
    %39 = arith.mulf %37, %38 : vector<16x32xf32>
    %40 = vector.broadcast %21 : vector<1x32xf32> to vector<16x32xf32>
    %41 = arith.addf %39, %40 : vector<16x32xf32>
    %c0_22 = arith.constant 0 : index
    %c0_23 = arith.constant 0 : index
    %42 = vector.load %arg8[%c0_22, %c0_23] : memref<16x32xf32, #tpu.memory_space<vmem>>, vector<16x32xf32>
    tpu.vector_store %arg8[%c0_22, %c0_23], %41 {strides = array<i32>} : memref<16x32xf32, #tpu.memory_space<vmem>>, vector<16x32xf32>,
    return
  }
  func.func @transform_0(%arg0: i32) -> (i32, i32) {
    %c0_i32 = arith.constant 0 : i32
    %c0_i32_0 = arith.constant 0 : i32
    return %arg0, %c0_i32 : i32, i32
  }
  func.func @transform_1(%arg0: i32) -> (i32, i32) {
    %c0_i32 = arith.constant 0 : i32
    %c0_i32_0 = arith.constant 0 : i32
    %c0_i32_1 = arith.constant 0 : i32
    return %c0_i32, %c0_i32_0 : i32, i32
  }
  func.func @transform_2(%arg0: i32) -> (i32, i32) {
    %c0_i32 = arith.constant 0 : i32
    %c0_i32_0 = arith.constant 0 : i32
    %c0_i32_1 = arith.constant 0 : i32
    return %c0_i32, %c0_i32_0 : i32, i32
  }
  func.func @transform_3(%arg0: i32) -> (i32, i32) {
    %c0_i32 = arith.constant 0 : i32
    %c0_i32_0 = arith.constant 0 : i32
    %c0_i32_1 = arith.constant 0 : i32
    return %c0_i32, %c0_i32_0 : i32, i32
  }
  func.func @transform_4(%arg0: i32) -> (i32, i32) {
    %c0_i32 = arith.constant 0 : i32
    %c0_i32_0 = arith.constant 0 : i32
    %c0_i32_1 = arith.constant 0 : i32
    return %c0_i32, %c0_i32_0 : i32, i32
  }
  func.func @transform_5(%arg0: i32) -> (i32, i32) {
    %c0_i32 = arith.constant 0 : i32
    %c0_i32_0 = arith.constant 0 : i32
    %c0_i32_1 = arith.constant 0 : i32
    return %c0_i32, %c0_i32_0 : i32, i32
  }
  func.func @transform_6(%arg0: i32) -> (i32, i32) {
    %c0_i32 = arith.constant 0 : i32
    %c0_i32_0 = arith.constant 0 : i32
    %c0_i32_1 = arith.constant 0 : i32
    return %c0_i32, %c0_i32_0 : i32, i32
  }
  func.func @transform_7(%arg0: i32) -> (i32, i32) {
    %c0_i32 = arith.constant 0 : i32
    %c0_i32_0 = arith.constant 0 : i32
    return %arg0, %c0_i32 : i32, i32
  }
}

</mosaic_0001>

<bundles_post_ra>
// kernel: tpu_custom_call.1
= control target key start
LH: loop header
LB: loop body
LE: loop exit
PB: predicated region body
PF: predicated region fallthrough
CT: control target
= control target key end

     0   :  { %vm40_vm0 = vcmask 261120   ;;  %s493_s0 = inlined_call_operand.vmem [shape: f32[16,32], index: 0, kind: input, shape index: {}]   ;;  %s494_s1 = inlined_call_operand.vmem [shape: f32[32,64], index: 1, kind: input, shape index: {}]   ;;  %s495_s2 = inlined_call_operand.vmem [shape: f32[1,64], index: 2, kind: input, shape index: {}]   ;;  %s496_s3 = inlined_call_operand.vmem [shape: f32[64,32], index: 3, kind: input, shape index: {}]   ;;  %s497_s4 = inlined_call_operand.vmem [shape: f32[1,32], index: 4, kind: input, shape index: {}]   ;;  %s498_s5 = inlined_call_operand.vmem [shape: f32[1,32], index: 5, kind: input, shape index: {}]   ;;  %s499_s6 = inlined_call_operand.vmem [shape: f32[1,32], index: 6, kind: input, shape index: {}]   ;;  %s500_s7 = inlined_call_operand.hbm [shape: f32[16,32], index: 7, kind: output, shape index: {}]  }
   0x1   :  { %v32_v0 = vld [vmem:[%s494_s1 + $0x18] sm:$0xff]  ;;  %v31_v1 = vld [vmem:[%s494_s1 + $0x10] sm:$0xff]  ;;  %v433_v2 = vld [vmem:[%s493_s0] sm:$0xff] }
   0x2   :  { %318 = vmatprep.subr.mxu0 %v32_v0  ;;  %v30_v3 = vld [vmem:[%s494_s1 + $0x8] sm:$0xff]  ;;  %326 = vmatprep.mubr.msk.f32.mxu0 %vm40_vm0, %v433_v2 }
   0x3   :  { %319 = vmatpush3.msra.mxu0 %v32_v0 }
   0x4   :  { %12 = vsyncpa [#allocation3], 0  ;;  %320 = vmatprep.subr.mxu0 %v31_v1  ;;  %v29_v4 = vld [vmem:[%s494_s1] sm:$0xff]  ;;  %v28_v5 = vld [vmem:[%s493_s0 + $0x8] sm:$0xff]  ;;  %vm147_vm1 = vcmask 523264   ;;  %s381_s9 = smov [#allocation2]  }
   0x5   :  { %321 = vmatpush3.msra.mxu0 %v31_v1  ;;  %v139_v6 = vld [vmem:[%s496_s3 + $0x38] sm:$0xff]  ;;  %v138_v7 = vld [vmem:[%s496_s3 + $0x30] sm:$0xff]  ;;  %v137_v8 = vld [vmem:[%s496_s3 + $0x28] sm:$0xff]  ;;  %s283_s10 = sshll.u32 %s381_s9, 4  ;;  %s284_s10 = int_to_ptr.vmem [resolvable:$true] %s283_s10 }
   0x6   :  { %322 = vmatprep.subr.mxu0 %v30_v3  ;;  %329 = vmatprep.subr.mxu1 %v139_v6  ;;  %v136_v9 = vld [vmem:[%s496_s3 + $0x20] sm:$0xff]  ;;  %v135_v10 = vld [vmem:[%s496_s3 + $0x18] sm:$0xff]  ;;  %v134_v11 = vld [vmem:[%s496_s3 + $0x10] sm:$0xff]  ;;  %s359_s11 = scalar_lea.vmem %s284_s10, 256  ;;  %p364_p1 = scmp.lt.s32.totalorder %s284_s10, %s284_s10 }
   0x7   :  { %323 = vmatpush3.msra.mxu0 %v30_v3  ;;  %330 = vmatpush3.msra.mxu1 %v139_v6  ;;  %v133_v12 = vld [vmem:[%s496_s3 + $0x8] sm:$0xff]  ;;  %v132_v13 = vld [vmem:[%s496_s3] sm:$0xff]  ;;  %p360_p0 = scmp.ne.s32.totalorder %s284_s10, %s359_s11  ;;  %p365_p2 = scmp.lt.s32.totalorder %s359_s11, %s359_s11 }
   0x8   :  { %324 = vmatprep.subr.mxu0 %v29_v4  ;;  %331 = vmatprep.subr.mxu1 %v138_v7  ;;  %v294_v14 = vld [vmem:[%s495_s2] ss:$0 sm:$0xff] }
   0x9   :  { %325 = vmatpush3.msra.mxu0 %v29_v4  ;;  %332 = vmatpush3.msra.mxu1 %v138_v7  ;;  %v297_v30 = vld [vmem:[%s497_s4] ss:$0 sm:$0xff]  ;;  %p366_p3 = por %p365_p2, %p364_p1 }
   0xa   :  { %327 = vmatmul.mubr.msk.f32.vlgmr.msra.gmra.mxu0 %vm40_vm0, %v28_v5  ;;  %333 = vmatprep.subr.mxu1 %v137_v8  ;;  %v300_v55 = vld [vmem:[%s498_s5] ss:$0 sm:$0xff] }
   0xb   :  { %334 = vmatpush3.msra.mxu1 %v137_v8  ;;  %v301_v57 = vld [vmem:[%s499_s6] ss:$0 sm:$0xff]  ;;  %p367_p4 = pnand %p366_p3, %p360_p0 }
   0xc   :  { %335 = vmatprep.subr.mxu1 %v136_v9 }
   0xd   :  { %336 = vmatpush3.msra.mxu1 %v136_v9 }
   0xe   :  { %337 = vmatprep.subr.mxu1 %v135_v10 }
   0xf   :  { %338 = vmatpush3.msra.mxu1 %v135_v10 }
  0x10   :  { %339 = vmatprep.subr.mxu1 %v134_v11 }
  0x11   :  { %340 = vmatpush3.msra.mxu1 %v134_v11 }
  0x12   :  { %341 = vmatprep.subr.mxu1 %v133_v12 }
  0x13   :  { %342 = vmatpush3.msra.mxu1 %v133_v12 }
  0x14   :  { %343 = vmatprep.subr.mxu1 %v132_v13 }
  0x15   :  { %344 = vmatpush3.msra.mxu1 %v132_v13 }
  0xca   :  { %v328_v15 = vpop.f32.mrf.mxu0 }
  0xcb   :  { %v119_v16 = vadd.f32 %v328_v15, %v294_v14 }
  0xcc   :  { %v113_v17 = vpop.f32.mrf.mxu0 }
  0xcd   :  { %v125_v18 = vmul.f32 0.70710677, %v119_v16  ;;  %v114_v19 = vadd.f32 %v294_v14, %v113_v17  ;;  %v123_v26 = vmul.f32 0.5, %v119_v16 }
  0xcf   :  { %351 = verf.f32 %v125_v18  ;;  %v124_v20 = vmul.f32 0.70710677, %v114_v19  ;;  %v122_v24 = vmul.f32 0.5, %v114_v19 }
  0xd1   :  { %353 = verf.f32 %v124_v20 }
  0xdc   :  { %v352_v21 = vpop.eup %351 }
  0xdd   :  { %v129_v23 = vadd.f32 1.0, %v352_v21 }
  0xde   :  { %v354_v22 = vpop.eup %353 }
  0xdf   :  { %v128_v25 = vadd.f32 1.0, %v354_v22  ;;  %v131_v28 = vmul.f32 %v129_v23, %v123_v26 }
  0xe1   :  { %v130_v27 = vmul.f32 %v128_v25, %v122_v24 }
  0xe3   :  { %345 = vmatprep.mubr.msk.f32.mxu1 %vm147_vm1, %v130_v27 }
  0xe4   :  { %346 = vmatmul.mubr.msk.f32.vlgmr.msra.gmra.mxu1 %vm147_vm1, %v131_v28 }
 0x1a4   :  { %v347_v29 = vpop.f32.mrf.mxu1 }
 0x1a5   :  { %v226_v32 = vadd.f32 %v347_v29, %v297_v30 }
 0x1a6   :  { %v220_v31 = vpop.f32.mrf.mxu1 }
 0x1a7   :  { %v221_v33 = vadd.f32 %v297_v30, %v220_v31  ;;  %v230_v36 = vadd.f32 %v226_v32, %v28_v5 }
 0x1a9   :  { %v229_v34 = vadd.f32 %v221_v33, %v433_v2  ;;  %v236_v37 = vsel %vm40_vm0, %v230_v36, 0.0 }
 0x1ab   :  { %v233_v35 = vsel %vm40_vm0, %v229_v34, 0.0 }
 0x1ac   :  { %234 = vadd.xlane.f32.xlu0 %v233_v35 }
 0x1b0   :  { %237 = vadd.xlane.f32.xlu0 %v236_v37 }
 0x235   :  { %v235_v38 = vpop.xlane.xlu0 %234 }
 0x236   :  { %v240_v39 = vmul.f32 0.03125, %v235_v38 }
 0x238   :  { %v242_v40 = vsub.f32 %v229_v34, %v240_v39 }
 0x239   :  { %v238_v41 = vpop.xlane.xlu0 %237 }
 0x23a   :  { %v241_v42 = vmul.f32 0.03125, %v238_v41  ;;  %v244_v43 = vmul.f32 %v242_v40, %v242_v40 }
 0x23c   :  { %v243_v44 = vsub.f32 %v230_v36, %v241_v42  ;;  %v246_v45 = vsel %vm40_vm0, %v244_v43, 0.0 }
 0x23d   :  { %247 = vadd.xlane.f32.xlu1 %v246_v45 }
 0x23e   :  { %v245_v46 = vmul.f32 %v243_v44, %v243_v44 }
 0x240   :  { %v249_v47 = vsel %vm40_vm0, %v245_v46, 0.0 }
 0x241   :  { %250 = vadd.xlane.f32.xlu1 %v249_v47 }
 0x2c6   :  { %v248_v48 = vpop.xlane.xlu1 %247 }
 0x2c7   :  { %v252_v49 = vmul.f32 0.03125, %v248_v48 }
 0x2c9   :  { %v254_v50 = vadd.f32 1e-05, %v252_v49 }
 0x2ca   :  { %v251_v51 = vpop.xlane.xlu1 %250 }
 0x2cb   :  { %355 = vrsqrt.f32 %v254_v50  ;;  %v253_v52 = vmul.f32 0.03125, %v251_v51 }
 0x2cd   :  { %v255_v53 = vadd.f32 1e-05, %v253_v52 }
 0x2cf   :  { %357 = vrsqrt.f32 %v255_v53 }
 0x2d8   :  { %v356_v54 = vpop.eup %355 }
 0x2d9   :  { %v258_v56 = vmul.f32 %v356_v54, %v242_v40 }
 0x2db   :  { %v266_v58 = vmul.f32 %v300_v55, %v258_v56 }
 0x2dc   :  { %v358_v59 = vpop.eup %357 }
 0x2dd   :  { %v259_v60 = vmul.f32 %v358_v59, %v243_v44  ;;  %v274_v61 = vadd.f32 %v301_v57, %v266_v58 }
 0x2df   :  { %v267_v62 = vmul.f32 %v300_v55, %v259_v60  ;;  %276 = vst.msk [vmem:[#allocation2] sm:$0xff] %vm40_vm0, %v274_v61 }
 0x2e1   :  { %v275_v63 = vadd.f32 %v301_v57, %v267_v62 }
 0x2e3   :  { %277 = vst.msk [vmem:[#allocation2 + $0x8] sm:$0xff] %vm40_vm0, %v275_v63 }
 0x2e4   :  { %370 = shalt.err (!%p367_p4)
}
 0x2e5   :  { %s382_s5 = smov 128   ;;  %s383_s6 = smov 8  }
 0x2e6   :  { %289 = dma.vmem_to_hbm [thread:$0]  %s284_s10, 256, %s500_s7, [#allocation3], %s382_s5, %s382_s5, %s383_s6  }
 0x2e7   :  { %379 = dma.done.wait [#allocation3], 256  }
 0x2e8   :  { %380 = vsyncadd [#allocation3], 4294967040 }
 0x2e9   :  { %293 = vsyncpa [#allocation3], 1 }

</bundles_post_ra>
